<compile_context>
chip_gen: v7x
topology: tpu7x:2x2x1
jax: 0.10.0
libtpu: 0.0.40
codegen_flags: <defaults>
</compile_context>

<pallas_src>
import functools

import jax
import jax.numpy as jnp
from jax.experimental import pallas as pl
from jax.experimental.pallas import tpu as pltpu

INIT_VAL = 0.3  # deterministic stand-in for config.init_val
LANES = 128     # vreg lane width
SUBLANES = 8    # vreg sublane count (f32)


def _cdiv(a, b):
    return -(-a // b)


def _round_up(v, m):
    return ((v + m - 1) // m) * m


def _fill_kernel(inv_s_ref, o_ref):
    # inv_s_ref: SMEM (1,) f32 holding exp(10 * variance) (hoisted, shared by all tiles)
    # o_ref:     VMEM (rows_block, 128) f32 lane-dense output slab tile
    o_ref[...] = jnp.full(o_ref.shape, inv_s_ref[0], dtype=o_ref.dtype)


def _fill_slab(inv_s, rows_padded, rows_block, nblk):
    return pl.pallas_call(
        _fill_kernel,
        out_shape=jax.ShapeDtypeStruct((rows_padded, LANES), jnp.float32),
        grid=(nblk,),
        in_specs=[
            # scalar parameter, resident in SMEM, same for every tile
            pl.BlockSpec(memory_space=pltpu.MemorySpace.SMEM),
        ],
        out_specs=pl.BlockSpec((rows_block, LANES), lambda i: (i, 0)),
        compiler_params=pltpu.CompilerParams(
            dimension_semantics=("parallel",),
        ),
    )(inv_s)


@functools.partial(jax.jit, static_argnames=("n", "tile_rows"))
def _forward_impl(variance, *, n, tile_rows):
    # Hoist the scalar transcendental out of the grid loop entirely.
    inv_s = jnp.exp(jnp.asarray(variance, jnp.float32) * 10.0).reshape((1,))

    if n == 0:
        # Empty batch: nothing to fill.
        return jnp.zeros((0, 1), jnp.float32)

    rows_needed = _cdiv(n, LANES)

    # Near-equal split of rows into blocks: padding bounded by <8 rows per block.
    nblk = _cdiv(rows_needed, tile_rows)
    # Megacore (v7x): keep >=2 blocks whenever each block can still be >=8 rows,
    # so the "parallel" grid axis can be sharded across both TensorCores.
    if rows_needed >= 2 * SUBLANES:
        nblk = max(nblk, 2)
    rows_block = _round_up(_cdiv(rows_needed, nblk), SUBLANES)
    nblk = _cdiv(rows_needed, rows_block)  # rounding may reduce the block count
    rows_padded = nblk * rows_block

    slab = _fill_slab(inv_s, rows_padded, rows_block, nblk)

    # (rows_padded, 128) row-major has the same contiguous bytes as
    # (rows_padded*128, 1): the reshape is a free re-interpretation.
    flat = slab.reshape(rows_padded * LANES, 1)
    if rows_padded * LANES == n:
        return flat
    # Only when N is not a multiple of 128 (minimal padding thanks to equal split);
    # lives inside the same jit as the kernel.
    return flat[:n]


def variance_network_forward(x, variance, *, tile_rows=8192):
    """x: (N, D) array (only N is used). variance: scalar float32 parameter.

    Returns (N, 1) float32 filled with exp(variance * 10)."""
    return _forward_impl(variance, n=int(x.shape[0]), tile_rows=int(tile_rows))


if __name__ == "__main__":
    key = jax.random.PRNGKey(0)

    # Parameter initialized deterministically as in __init__: variance = init_val
    variance = jnp.float32(INIT_VAL)
    expected = jnp.exp(variance * 10.0)

    # Small example input consistent with the module: a batch of N points, D features.
    N, D = 16, 3
    x = jax.random.normal(key, (N, D), dtype=jnp.float32)
    out = jax.block_until_ready(variance_network_forward(x, variance))
    ref = jnp.ones((N, 1), jnp.float32) * expected
    assert out.shape == (N, 1)
    assert jnp.allclose(out, ref, rtol=1e-6, atol=1e-6)

    # Second shape: N not a multiple of the lane width, exercises pad + slice path
    # and the >=2-block (megacore) grid.
    N2 = 300
    x2 = jax.random.normal(key, (N2, D), dtype=jnp.float32)
    out2 = jax.block_until_ready(variance_network_forward(x2, variance))
    ref2 = jnp.ones((N2, 1), jnp.float32) * expected
    assert out2.shape == (N2, 1)
    assert jnp.allclose(out2, ref2, rtol=1e-6, atol=1e-6)

    # N an exact multiple of 128*8: no slice epilogue at all (pure kernel write).
    N3 = 2048
    x3 = jax.random.normal(key, (N3, D), dtype=jnp.float32)
    out3 = jax.block_until_ready(variance_network_forward(x3, variance))
    assert out3.shape == (N3, 1)
    assert jnp.allclose(out3, jnp.full((N3, 1), expected), rtol=1e-6, atol=1e-6)

    # Empty batch guard (previously a ZeroDivisionError at trace time).
    x0 = jnp.zeros((0, D), jnp.float32)
    out0 = jax.block_until_ready(variance_network_forward(x0, variance))
    assert out0.shape == (0, 1)

    print("KERNEL_OK")
</pallas_src>

<mosaic_0001>
module attributes {stable_mosaic.version = 11 : i64} {
  func.func @_fill_kernel(%arg0: i32, %arg1: memref<1xf32, #tpu.memory_space<smem>>, %arg2: memref<8x128xf32, #tpu.memory_space<vmem>>) attributes {dimension_semantics = [#tpu.dimension_semantics<parallel>], iteration_bounds = array<i64: 1>, scalar_prefetch = 0 : i64, scratch_operands = 0 : i64, tpu.core_type = #tpu.core_type<tc>, window_params = [{transform_indices = @transform_0, window_bounds = array<i64: 1>}, {transform_indices = @transform_1, window_bounds = array<i64: 8, 128>}]} {
    %c0 = arith.constant 0 : index
    %0 = memref.load %arg1[%c0] : memref<1xf32, #tpu.memory_space<smem>>
    %1 = vector.broadcast %0 : f32 to vector<8x128xf32>
    %c0_0 = arith.constant 0 : index
    %c0_1 = arith.constant 0 : index
    %2 = vector.load %arg2[%c0_0, %c0_1] : memref<8x128xf32, #tpu.memory_space<vmem>>, vector<8x128xf32>
    tpu.vector_store %arg2[%c0_0, %c0_1], %1 {strides = array<i32>} : memref<8x128xf32, #tpu.memory_space<vmem>>, vector<8x128xf32>,
    return
  }
  func.func @transform_0(%arg0: i32) -> i32 {
    %c0_i32 = arith.constant 0 : i32
    %c0_i32_0 = arith.constant 0 : i32
    return %c0_i32 : i32
  }
  func.func @transform_1(%arg0: i32) -> (i32, i32) {
    %c0_i32 = arith.constant 0 : i32
    %c0_i32_0 = arith.constant 0 : i32
    return %arg0, %c0_i32 : i32, i32
  }
}

</mosaic_0001>

<bundles_post_ra>
// kernel: _forward_impl.1
= control target key start
LH: loop header
LB: loop body
LE: loop exit
PB: predicated region body
PF: predicated region fallthrough
CT: control target
= control target key end

     0   :  { %s32_s0 = inlined_call_operand.<no memory space> [shape: f32[1], index: 0, kind: input, shape index: {}]   ;;  %s33_s1 = inlined_call_operand.vmem [shape: f32[8,128], index: 1, kind: output, shape index: {}]  }
   0x1   :  { %v10_v0 = vstv %s32_s0 }
   0x2   :  { %11 = vst [vmem:[%s33_s1] sm:$0xff] %v10_v0 }

</bundles_post_ra>
